<compile_context>
chip_gen: v5e
topology: v5e:2x2
jax: 0.10.0
libtpu: 0.0.40
codegen_flags: <defaults>
</compile_context>

<pallas_src>
import math

import jax
import jax.numpy as jnp
from jax import lax
from jax.experimental import pallas as pl
from jax.experimental.pallas import tpu as pltpu


# ----------------------------------------------------------------------------
# Helpers
# ----------------------------------------------------------------------------
def _round_up(n, m):
    return ((n + m - 1) // m) * m


def _residual_match(x_f32, din, dout):
    """Trace-time specialization of Residual._match_dimensions applied to x.

    Concat-free: identity / slice-adds / iota mask / 0-1 fold matrix (MXU).
    Pure jnp, so it works identically inside the Pallas kernel and in the
    matched-math reference.
    """
    assert x_f32.shape[-1] == din
    if din == dout:
        return x_f32
    if din > dout:
        if din % dout == 0:
            # PyTorch _fold with full chunks: pure VPU adds, no concat.
            acc = x_f32[..., 0:dout]
            for i0 in range(dout, din, dout):
                acc = acc + x_f32[..., i0:i0 + dout]
            return acc
        # General fold: 0/1 fold matrix applied on the MXU (huge MXU slack at
        # these layer widths, so this is effectively free).
        i = lax.broadcasted_iota(jnp.int32, (din, dout), 0)
        j = lax.broadcasted_iota(jnp.int32, (din, dout), 1)
        fold = (i % dout == j).astype(jnp.float32)
        return jnp.dot(x_f32, fold, preferred_element_type=jnp.float32)
    # din < dout: the PyTorch torch.cat expansion only yields a width-matched
    # tensor when din == 1; any other widening crashes in the reference.
    if din != 1:
        raise NotImplementedError(
            "Residual expansion with 1 < in_dim < out_dim crashes in the "
            "PyTorch reference; refusing to silently diverge.")
    lane = lax.broadcasted_iota(jnp.int32, x_f32.shape[:-1] + (dout,),
                                x_f32.ndim - 1)
    return jnp.where(lane < 1, x_f32, 0.0)


# ----------------------------------------------------------------------------
# Fused Pallas kernel (whole MLP in one call)
# ----------------------------------------------------------------------------
def _make_fused_kernel(shape, compute_dtype):
    n_layers = len(shape) - 1

    def kernel(x_ref, *refs):
        # refs = (w0, b0, w1, b1, ..., w_last_padded, b_last_padded, o_ref)
        o_ref = refs[-1]
        wb = refs[:-1]

        x_lo = x_ref[...]                      # compute_dtype straight from HBM
        x_f32 = x_lo.astype(jnp.float32)       # single upcast per tile

        # Residual(Linear -> ReLU) blocks — intermediates live only in vregs.
        for i in range(n_layers - 1):
            w = wb[2 * i][...]                 # already compute_dtype
            b = wb[2 * i + 1][...]             # f32
            fx = jnp.dot(x_lo, w, preferred_element_type=jnp.float32)
            fx = jnp.maximum(fx + b, 0.0)      # bias/ReLU in f32 (v5e-safe)
            x_f32 = fx + _residual_match(x_f32, shape[i], shape[i + 1])
            x_lo = x_f32.astype(compute_dtype)  # one downcast per layer

        # Final (non-residual) Linear, padded to a lane-dense (128) width.
        w = wb[-2][...]
        b = wb[-1][...]
        y = jnp.dot(x_lo, w, preferred_element_type=jnp.float32) + b
        o_ref[...] = y.astype(o_ref.dtype)

    return kernel


# ----------------------------------------------------------------------------
# Wrapper around pallas_call
# ----------------------------------------------------------------------------
def mlp_with_residual_forward(x, shape, params, *,
                              batch_tile=1024,
                              compute_dtype=jnp.bfloat16,
                              out_dtype=jnp.bfloat16):
    """Fused forward pass of MLPWithResidualLayers.

    NOTE (explicit precision choice): MXU operands are `compute_dtype` and the
    returned activations are `out_dtype` (both bf16 by default, a bandwidth
    optimization).  Pass float32 for full-precision I/O.
    """
    B, din0 = x.shape
    assert din0 == shape[0]
    d_out = shape[-1]
    n_layers = len(shape) - 1
    assert len(params) == n_layers

    # Lane-dense final output: pad last-layer W/b columns to a multiple of 128
    # (128 exactly unless d_out > 128) so the only store is an unmasked
    # full-lane vst; the wrapper slices back to (B, d_out).
    n_pad = _round_up(max(d_out, 128), 128)

    # Weights cast once to the MXU operand dtype; biases stay f32 (bias/ReLU/
    # residual math is done in f32 inside the kernel).
    ws = [w.astype(compute_dtype) for (w, _) in params]
    bs = [b.astype(jnp.float32).reshape(1, -1) for (_, b) in params]
    w_last_p = jnp.zeros((shape[-2], n_pad), compute_dtype).at[:, :d_out].set(ws[-1])
    b_last_p = jnp.zeros((1, n_pad), jnp.float32).at[:, :d_out].set(bs[-1])

    wb_arrays = []
    for w, b in zip(ws[:-1], bs[:-1]):
        wb_arrays += [w, b]
    wb_arrays += [w_last_p, b_last_p]

    # Batch tiling: pad to a sublane multiple of 8; prefer large tiles (the
    # kernel is HBM/overhead-bound at these widths) but keep >= 2 grid tiles
    # when B allows so v7x's two TensorCores both get work.
    b_sub = _round_up(B, 8)
    tb = _round_up(min(batch_tile, b_sub), 8)
    if b_sub >= 16 and b_sub // tb < 2:
        tb = _round_up((b_sub + 1) // 2, 8)

    # VMEM budget: weights single-buffered + double-buffered x / out tiles.
    in_isz = jnp.dtype(compute_dtype).itemsize
    out_isz = jnp.dtype(out_dtype).itemsize
    weight_bytes = sum(int(a.size) * a.dtype.itemsize for a in wb_arrays)

    def _io_bytes(t):
        return 2 * t * din0 * in_isz + 2 * t * n_pad * out_isz

    # Keep the footprint comfortably inside the smallest physical VMEM
    # (v7x: 64 MiB); shrink the batch tile if a huge shape/tile would blow it.
    while weight_bytes + _io_bytes(tb) > (40 << 20) and tb > 8:
        tb = _round_up(tb // 2, 8)
    vmem_needed = weight_bytes + _io_bytes(tb)
    # TODO(synk): for very deep/wide `shape` where the resident weight stack
    # alone exceeds ~40 MiB, switch to a per-layer pltpu.emit_pipeline over
    # the weight list instead of keeping all weights resident.
    vmem_limit = int(min(max(2 * vmem_needed + (4 << 20), 16 << 20), 48 << 20))

    b_pad = _round_up(B, tb)
    x_c = x.astype(compute_dtype)
    x_p = x_c if b_pad == B else (
        jnp.zeros((b_pad, din0), compute_dtype).at[:B].set(x_c))
    flat = [x_p] + wb_arrays

    flops = 2 * b_pad * sum(di * do for di, do in zip(shape[:-1], shape[1:]))
    bytes_accessed = sum(int(a.size) * a.dtype.itemsize for a in flat)
    bytes_accessed += b_pad * n_pad * out_isz

    def _call(single_buffer_weights):
        wmode = ({"pipeline_mode": pl.Buffered(1)}
                 if single_buffer_weights else {})
        in_specs = [pl.BlockSpec((tb, din0), lambda m: (m, 0))]
        for a in flat[1:]:
            # Grid-invariant weight/bias blocks: resident, single-buffered.
            in_specs.append(pl.BlockSpec(a.shape, lambda m: (0, 0), **wmode))
        out_specs = pl.BlockSpec((tb, n_pad), lambda m: (m, 0))
        return pl.pallas_call(
            _make_fused_kernel(shape, compute_dtype),
            out_shape=jax.ShapeDtypeStruct((b_pad, n_pad), out_dtype),
            grid=(b_pad // tb,),
            in_specs=in_specs,
            out_specs=out_specs,
            compiler_params=pltpu.CompilerParams(
                dimension_semantics=("parallel",),
                vmem_limit_bytes=vmem_limit),
            cost_estimate=pl.CostEstimate(
                flops=int(flops), transcendentals=0,
                bytes_accessed=int(bytes_accessed)),
        )(*flat)

    try:
        out = jax.block_until_ready(_call(True))
    except Exception:  # pragma: no cover — jax without Buffered(1) support
        out = jax.block_until_ready(_call(False))

    return out[:B, :d_out]


# ----------------------------------------------------------------------------
# Parameter construction (PyTorch nn.Linear default init, float32)
# ----------------------------------------------------------------------------
def init_params(shape, key):
    params = []
    for din, dout in zip(shape[:-1], shape[1:]):
        key, kw, kb = jax.random.split(key, 3)
        bound = 1.0 / math.sqrt(din)
        w = jax.random.uniform(kw, (din, dout), jnp.float32, -bound, bound)
        b = jax.random.uniform(kb, (dout,), jnp.float32, -bound, bound)
        params.append((w, b))
    return params


# ----------------------------------------------------------------------------
# References
# ----------------------------------------------------------------------------
def reference_forward_f32(x, shape, params):
    """Pure-float32 reference mirroring the PyTorch module exactly."""
    x = x.astype(jnp.float32)
    for i in range(len(shape) - 2):
        w, b = params[i]
        fx = jnp.maximum(x @ w + b, 0.0)
        din, dout = shape[i], shape[i + 1]
        if din == dout:
            res = x
        elif din > dout:
            res = jnp.zeros(x.shape[:-1] + (dout,), x.dtype)
            for k in range(din):                       # folded[..., k%dout] += x[..., k]
                res = res.at[..., k % dout].add(x[..., k])
        else:
            # PyTorch only survives this branch when din == 1.
            res = jnp.concatenate([x] + [jnp.zeros_like(x)] * (dout - din), -1)
        x = fx + res
    w, b = params[-1]
    return x @ w + b


def reference_forward_matched(x, shape, params,
                              compute_dtype=jnp.bfloat16,
                              out_dtype=jnp.bfloat16):
    """Same bf16-MXU / f32-accumulate / bf16-store math as the kernel."""
    x_lo = x.astype(compute_dtype)
    x_f32 = x_lo.astype(jnp.float32)
    for i in range(len(shape) - 2):
        w, b = params[i]
        fx = jnp.dot(x_lo, w.astype(compute_dtype),
                     preferred_element_type=jnp.float32)
        fx = jnp.maximum(fx + b.astype(jnp.float32), 0.0)
        x_f32 = fx + _residual_match(x_f32, shape[i], shape[i + 1])
        x_lo = x_f32.astype(compute_dtype)
    w, b = params[-1]
    y = jnp.dot(x_lo, w.astype(compute_dtype),
                preferred_element_type=jnp.float32) + b.astype(jnp.float32)
    return y.astype(out_dtype)


# ----------------------------------------------------------------------------
if __name__ == "__main__":
    # shape chosen so every Residual layer is a case the PyTorch code handles
    # without crashing: 32->32 (identity residual), 32->16 (fold residual),
    # then the final Linear 16->8.
    shape = (32, 32, 16, 8)
    batch = 2

    key = jax.random.PRNGKey(0)
    key, kx = jax.random.split(key)
    x = jax.random.normal(kx, (batch, shape[0]), jnp.float32)
    params = init_params(shape, key)

    out = jax.block_until_ready(mlp_with_residual_forward(x, shape, params))
    assert out.shape == (batch, shape[-1])
    assert out.dtype == jnp.dtype(jnp.bfloat16)

    out_f32 = out.astype(jnp.float32)

    # Tight check: identical bf16-MXU / f32-accumulate math as the kernel.
    ref_matched = reference_forward_matched(x, shape, params).astype(jnp.float32)
    assert jnp.allclose(out_f32, ref_matched, atol=2e-3, rtol=2e-3), \
        "mismatch vs matched-math reference"

    # Loose check against true-f32 PyTorch semantics (tolerance covers the
    # intentional bf16 operand / bf16 output rounding).
    ref_f32 = reference_forward_f32(x, shape, params)
    assert jnp.allclose(out_f32, ref_f32, atol=1e-1, rtol=1e-1), \
        "mismatch vs float32 reference"

    print("KERNEL_OK")
</pallas_src>

<mosaic_0001>
module attributes {stable_mosaic.version = 11 : i64} {
  func.func @kernel(%arg0: i32, %arg1: memref<8x32xbf16, #tpu.memory_space<vmem>>, %arg2: memref<32x32xbf16, #tpu.memory_space<vmem>>, %arg3: memref<1x32xf32, #tpu.memory_space<vmem>>, %arg4: memref<32x16xbf16, #tpu.memory_space<vmem>>, %arg5: memref<1x16xf32, #tpu.memory_space<vmem>>, %arg6: memref<16x128xbf16, #tpu.memory_space<vmem>>, %arg7: memref<1x128xf32, #tpu.memory_space<vmem>>, %arg8: memref<8x128xbf16, #tpu.memory_space<vmem>>) attributes {dimension_semantics = [#tpu.dimension_semantics<parallel>], iteration_bounds = array<i64: 1>, scalar_prefetch = 0 : i64, scratch_operands = 0 : i64, tpu.core_type = #tpu.core_type<tc>, window_params = [{transform_indices = @transform_0, window_bounds = array<i64: 8, 32>}, {pipeline_mode = #tpu.pipeline_mode<synchronous>, transform_indices = @transform_1, window_bounds = array<i64: 32, 32>}, {pipeline_mode = #tpu.pipeline_mode<synchronous>, transform_indices = @transform_2, window_bounds = array<i64: 1, 32>}, {pipeline_mode = #tpu.pipeline_mode<synchronous>, transform_indices = @transform_3, window_bounds = array<i64: 32, 16>}, {pipeline_mode = #tpu.pipeline_mode<synchronous>, transform_indices = @transform_4, window_bounds = array<i64: 1, 16>}, {pipeline_mode = #tpu.pipeline_mode<synchronous>, transform_indices = @transform_5, window_bounds = array<i64: 16, 128>}, {pipeline_mode = #tpu.pipeline_mode<synchronous>, transform_indices = @transform_6, window_bounds = array<i64: 1, 128>}, {transform_indices = @transform_7, window_bounds = array<i64: 8, 128>}]} {
    %c0 = arith.constant 0 : index
    %c0_0 = arith.constant 0 : index
    %0 = vector.load %arg1[%c0, %c0_0] : memref<8x32xbf16, #tpu.memory_space<vmem>>, vector<8x32xbf16>
    %1 = arith.extf %0 : vector<8x32xbf16> to vector<8x32xf32>
    %c0_1 = arith.constant 0 : index
    %c0_2 = arith.constant 0 : index
    %2 = vector.load %arg2[%c0_1, %c0_2] : memref<32x32xbf16, #tpu.memory_space<vmem>>, vector<32x32xbf16>
    %c0_3 = arith.constant 0 : index
    %c0_4 = arith.constant 0 : index
    %3 = vector.load %arg3[%c0_3, %c0_4] : memref<1x32xf32, #tpu.memory_space<vmem>>, vector<1x32xf32>
    %cst = arith.constant dense<0.000000e+00> : vector<8x32xf32>
    %4 = tpu.matmul %0, %2, %cst {dimension_numbers = #tpu.dot_dimension_numbers<[1], [0], [0], [1], [0, 0, 1, 1], [], []>} : vector<8x32xbf16>, vector<32x32xbf16>, vector<8x32xf32> -> vector<8x32xf32>
    %5 = vector.broadcast %3 : vector<1x32xf32> to vector<8x32xf32>
    %6 = arith.addf %4, %5 : vector<8x32xf32>
    %cst_5 = arith.constant 0.000000e+00 : f32
    %7 = vector.broadcast %cst_5 : f32 to vector<8x32xf32>
    %8 = arith.maximumf %6, %7 : vector<8x32xf32>
    %9 = arith.addf %8, %1 : vector<8x32xf32>
    %10 = arith.truncf %9 : vector<8x32xf32> to vector<8x32xbf16>
    %c0_6 = arith.constant 0 : index
    %c0_7 = arith.constant 0 : index
    %11 = vector.load %arg4[%c0_6, %c0_7] : memref<32x16xbf16, #tpu.memory_space<vmem>>, vector<32x16xbf16>
    %c0_8 = arith.constant 0 : index
    %c0_9 = arith.constant 0 : index
    %12 = vector.load %arg5[%c0_8, %c0_9] : memref<1x16xf32, #tpu.memory_space<vmem>>, vector<1x16xf32>
    %cst_10 = arith.constant dense<0.000000e+00> : vector<8x16xf32>
    %13 = tpu.matmul %10, %11, %cst_10 {dimension_numbers = #tpu.dot_dimension_numbers<[1], [0], [0], [1], [0, 0, 1, 1], [], []>} : vector<8x32xbf16>, vector<32x16xbf16>, vector<8x16xf32> -> vector<8x16xf32>
    %14 = vector.broadcast %12 : vector<1x16xf32> to vector<8x16xf32>
    %15 = arith.addf %13, %14 : vector<8x16xf32>
    %cst_11 = arith.constant 0.000000e+00 : f32
    %16 = vector.broadcast %cst_11 : f32 to vector<8x16xf32>
    %17 = arith.maximumf %15, %16 : vector<8x16xf32>
    %18 = vector.extract_strided_slice %9 {offsets = [0, 0], sizes = [8, 16], strides = [1, 1]} : vector<8x32xf32> to vector<8x16xf32>
    %19 = vector.extract_strided_slice %9 {offsets = [0, 16], sizes = [8, 16], strides = [1, 1]} : vector<8x32xf32> to vector<8x16xf32>
    %20 = arith.addf %18, %19 : vector<8x16xf32>
    %21 = arith.addf %17, %20 : vector<8x16xf32>
    %22 = arith.truncf %21 : vector<8x16xf32> to vector<8x16xbf16>
    %c0_12 = arith.constant 0 : index
    %c0_13 = arith.constant 0 : index
    %23 = vector.load %arg6[%c0_12, %c0_13] : memref<16x128xbf16, #tpu.memory_space<vmem>>, vector<16x128xbf16>
    %c0_14 = arith.constant 0 : index
    %c0_15 = arith.constant 0 : index
    %24 = vector.load %arg7[%c0_14, %c0_15] : memref<1x128xf32, #tpu.memory_space<vmem>>, vector<1x128xf32>
    %cst_16 = arith.constant dense<0.000000e+00> : vector<8x128xf32>
    %25 = tpu.matmul %22, %23, %cst_16 {dimension_numbers = #tpu.dot_dimension_numbers<[1], [0], [0], [1], [0, 0, 1, 1], [], []>} : vector<8x16xbf16>, vector<16x128xbf16>, vector<8x128xf32> -> vector<8x128xf32>
    %26 = vector.broadcast %24 : vector<1x128xf32> to vector<8x128xf32>
    %27 = arith.addf %25, %26 : vector<8x128xf32>
    %28 = arith.truncf %27 : vector<8x128xf32> to vector<8x128xbf16>
    %c0_17 = arith.constant 0 : index
    %c0_18 = arith.constant 0 : index
    %29 = vector.load %arg8[%c0_17, %c0_18] : memref<8x128xbf16, #tpu.memory_space<vmem>>, vector<8x128xbf16>
    tpu.vector_store %arg8[%c0_17, %c0_18], %28 {strides = array<i32>} : memref<8x128xbf16, #tpu.memory_space<vmem>>, vector<8x128xbf16>,
    return
  }
  func.func @transform_0(%arg0: i32) -> (i32, i32) {
    %c0_i32 = arith.constant 0 : i32
    %c0_i32_0 = arith.constant 0 : i32
    return %arg0, %c0_i32 : i32, i32
  }
  func.func @transform_1(%arg0: i32) -> (i32, i32) {
    %c0_i32 = arith.constant 0 : i32
    %c0_i32_0 = arith.constant 0 : i32
    %c0_i32_1 = arith.constant 0 : i32
    return %c0_i32, %c0_i32_0 : i32, i32
  }
  func.func @transform_2(%arg0: i32) -> (i32, i32) {
    %c0_i32 = arith.constant 0 : i32
    %c0_i32_0 = arith.constant 0 : i32
    %c0_i32_1 = arith.constant 0 : i32
    return %c0_i32, %c0_i32_0 : i32, i32
  }
  func.func @transform_3(%arg0: i32) -> (i32, i32) {
    %c0_i32 = arith.constant 0 : i32
    %c0_i32_0 = arith.constant 0 : i32
    %c0_i32_1 = arith.constant 0 : i32
    return %c0_i32, %c0_i32_0 : i32, i32
  }
  func.func @transform_4(%arg0: i32) -> (i32, i32) {
    %c0_i32 = arith.constant 0 : i32
    %c0_i32_0 = arith.constant 0 : i32
    %c0_i32_1 = arith.constant 0 : i32
    return %c0_i32, %c0_i32_0 : i32, i32
  }
  func.func @transform_5(%arg0: i32) -> (i32, i32) {
    %c0_i32 = arith.constant 0 : i32
    %c0_i32_0 = arith.constant 0 : i32
    %c0_i32_1 = arith.constant 0 : i32
    return %c0_i32, %c0_i32_0 : i32, i32
  }
  func.func @transform_6(%arg0: i32) -> (i32, i32) {
    %c0_i32 = arith.constant 0 : i32
    %c0_i32_0 = arith.constant 0 : i32
    %c0_i32_1 = arith.constant 0 : i32
    return %c0_i32, %c0_i32_0 : i32, i32
  }
  func.func @transform_7(%arg0: i32) -> (i32, i32) {
    %c0_i32 = arith.constant 0 : i32
    %c0_i32_0 = arith.constant 0 : i32
    return %arg0, %c0_i32 : i32, i32
  }
}

module attributes {stable_mosaic.version = 11 : i64} {
  func.func @kernel(%arg0: i32, %arg1: memref<8x32xbf16, #tpu.memory_space<vmem>>, %arg2: memref<32x32xbf16, #tpu.memory_space<vmem>>, %arg3: memref<1x32xf32, #tpu.memory_space<vmem>>, %arg4: memref<32x16xbf16, #tpu.memory_space<vmem>>, %arg5: memref<1x16xf32, #tpu.memory_space<vmem>>, %arg6: memref<16x128xbf16, #tpu.memory_space<vmem>>, %arg7: memref<1x128xf32, #tpu.memory_space<vmem>>, %arg8: memref<8x128xbf16, #tpu.memory_space<vmem>>) attributes {dimension_semantics = [#tpu.dimension_semantics<parallel>], iteration_bounds = array<i64: 1>, scalar_prefetch = 0 : i64, scratch_operands = 0 : i64, tpu.core_type = #tpu.core_type<tc>, window_params = [{transform_indices = @transform_0, window_bounds = array<i64: 8, 32>}, {pipeline_mode = #tpu.pipeline_mode<synchronous>, transform_indices = @transform_1, window_bounds = array<i64: 32, 32>}, {pipeline_mode = #tpu.pipeline_mode<synchronous>, transform_indices = @transform_2, window_bounds = array<i64: 1, 32>}, {pipeline_mode = #tpu.pipeline_mode<synchronous>, transform_indices = @transform_3, window_bounds = array<i64: 32, 16>}, {pipeline_mode = #tpu.pipeline_mode<synchronous>, transform_indices = @transform_4, window_bounds = array<i64: 1, 16>}, {pipeline_mode = #tpu.pipeline_mode<synchronous>, transform_indices = @transform_5, window_bounds = array<i64: 16, 128>}, {pipeline_mode = #tpu.pipeline_mode<synchronous>, transform_indices = @transform_6, window_bounds = array<i64: 1, 128>}, {transform_indices = @transform_7, window_bounds = array<i64: 8, 128>}]} {
    %c0 = arith.constant 0 : index
    %c0_0 = arith.constant 0 : index
    %0 = vector.load %arg1[%c0, %c0_0] : memref<8x32xbf16, #tpu.memory_space<vmem>>, vector<8x32xbf16>
    %1 = arith.extf %0 : vector<8x32xbf16> to vector<8x32xf32>
    %c0_1 = arith.constant 0 : index
    %c0_2 = arith.constant 0 : index
    %2 = vector.load %arg2[%c0_1, %c0_2] : memref<32x32xbf16, #tpu.memory_space<vmem>>, vector<32x32xbf16>
    %c0_3 = arith.constant 0 : index
    %c0_4 = arith.constant 0 : index
    %3 = vector.load %arg3[%c0_3, %c0_4] : memref<1x32xf32, #tpu.memory_space<vmem>>, vector<1x32xf32>
    %cst = arith.constant dense<0.000000e+00> : vector<8x32xf32>
    %4 = tpu.matmul %0, %2, %cst {dimension_numbers = #tpu.dot_dimension_numbers<[1], [0], [0], [1], [0, 0, 1, 1], [], []>} : vector<8x32xbf16>, vector<32x32xbf16>, vector<8x32xf32> -> vector<8x32xf32>
    %5 = vector.broadcast %3 : vector<1x32xf32> to vector<8x32xf32>
    %6 = arith.addf %4, %5 : vector<8x32xf32>
    %cst_5 = arith.constant 0.000000e+00 : f32
    %7 = vector.broadcast %cst_5 : f32 to vector<8x32xf32>
    %8 = arith.maximumf %6, %7 : vector<8x32xf32>
    %9 = arith.addf %8, %1 : vector<8x32xf32>
    %10 = arith.truncf %9 : vector<8x32xf32> to vector<8x32xbf16>
    %c0_6 = arith.constant 0 : index
    %c0_7 = arith.constant 0 : index
    %11 = vector.load %arg4[%c0_6, %c0_7] : memref<32x16xbf16, #tpu.memory_space<vmem>>, vector<32x16xbf16>
    %c0_8 = arith.constant 0 : index
    %c0_9 = arith.constant 0 : index
    %12 = vector.load %arg5[%c0_8, %c0_9] : memref<1x16xf32, #tpu.memory_space<vmem>>, vector<1x16xf32>
    %cst_10 = arith.constant dense<0.000000e+00> : vector<8x16xf32>
    %13 = tpu.matmul %10, %11, %cst_10 {dimension_numbers = #tpu.dot_dimension_numbers<[1], [0], [0], [1], [0, 0, 1, 1], [], []>} : vector<8x32xbf16>, vector<32x16xbf16>, vector<8x16xf32> -> vector<8x16xf32>
    %14 = vector.broadcast %12 : vector<1x16xf32> to vector<8x16xf32>
    %15 = arith.addf %13, %14 : vector<8x16xf32>
    %cst_11 = arith.constant 0.000000e+00 : f32
    %16 = vector.broadcast %cst_11 : f32 to vector<8x16xf32>
    %17 = arith.maximumf %15, %16 : vector<8x16xf32>
    %18 = vector.extract_strided_slice %9 {offsets = [0, 0], sizes = [8, 16], strides = [1, 1]} : vector<8x32xf32> to vector<8x16xf32>
    %19 = vector.extract_strided_slice %9 {offsets = [0, 16], sizes = [8, 16], strides = [1, 1]} : vector<8x32xf32> to vector<8x16xf32>
    %20 = arith.addf %18, %19 : vector<8x16xf32>
    %21 = arith.addf %17, %20 : vector<8x16xf32>
    %22 = arith.truncf %21 : vector<8x16xf32> to vector<8x16xbf16>
    %c0_12 = arith.constant 0 : index
    %c0_13 = arith.constant 0 : index
    %23 = vector.load %arg6[%c0_12, %c0_13] : memref<16x128xbf16, #tpu.memory_space<vmem>>, vector<16x128xbf16>
    %c0_14 = arith.constant 0 : index
    %c0_15 = arith.constant 0 : index
    %24 = vector.load %arg7[%c0_14, %c0_15] : memref<1x128xf32, #tpu.memory_space<vmem>>, vector<1x128xf32>
    %cst_16 = arith.constant dense<0.000000e+00> : vector<8x128xf32>
    %25 = tpu.matmul %22, %23, %cst_16 {dimension_numbers = #tpu.dot_dimension_numbers<[1], [0], [0], [1], [0, 0, 1, 1], [], []>} : vector<8x16xbf16>, vector<16x128xbf16>, vector<8x128xf32> -> vector<8x128xf32>
    %26 = vector.broadcast %24 : vector<1x128xf32> to vector<8x128xf32>
    %27 = arith.addf %25, %26 : vector<8x128xf32>
    %28 = arith.truncf %27 : vector<8x128xf32> to vector<8x128xbf16>
    %c0_17 = arith.constant 0 : index
    %c0_18 = arith.constant 0 : index
    %29 = vector.load %arg8[%c0_17, %c0_18] : memref<8x128xbf16, #tpu.memory_space<vmem>>, vector<8x128xbf16>
    tpu.vector_store %arg8[%c0_17, %c0_18], %28 {strides = array<i32>} : memref<8x128xbf16, #tpu.memory_space<vmem>>, vector<8x128xbf16>,
    return
  }
  func.func @transform_0(%arg0: i32) -> (i32, i32) {
    %c0_i32 = arith.constant 0 : i32
    %c0_i32_0 = arith.constant 0 : i32
    return %arg0, %c0_i32 : i32, i32
  }
  func.func @transform_1(%arg0: i32) -> (i32, i32) {
    %c0_i32 = arith.constant 0 : i32
    %c0_i32_0 = arith.constant 0 : i32
    %c0_i32_1 = arith.constant 0 : i32
    return %c0_i32, %c0_i32_0 : i32, i32
  }
  func.func @transform_2(%arg0: i32) -> (i32, i32) {
    %c0_i32 = arith.constant 0 : i32
    %c0_i32_0 = arith.constant 0 : i32
    %c0_i32_1 = arith.constant 0 : i32
    return %c0_i32, %c0_i32_0 : i32, i32
  }
  func.func @transform_3(%arg0: i32) -> (i32, i32) {
    %c0_i32 = arith.constant 0 : i32
    %c0_i32_0 = arith.constant 0 : i32
    %c0_i32_1 = arith.constant 0 : i32
    return %c0_i32, %c0_i32_0 : i32, i32
  }
  func.func @transform_4(%arg0: i32) -> (i32, i32) {
    %c0_i32 = arith.constant 0 : i32
    %c0_i32_0 = arith.constant 0 : i32
    %c0_i32_1 = arith.constant 0 : i32
    return %c0_i32, %c0_i32_0 : i32, i32
  }
  func.func @transform_5(%arg0: i32) -> (i32, i32) {
    %c0_i32 = arith.constant 0 : i32
    %c0_i32_0 = arith.constant 0 : i32
    %c0_i32_1 = arith.constant 0 : i32
    return %c0_i32, %c0_i32_0 : i32, i32
  }
  func.func @transform_6(%arg0: i32) -> (i32, i32) {
    %c0_i32 = arith.constant 0 : i32
    %c0_i32_0 = arith.constant 0 : i32
    %c0_i32_1 = arith.constant 0 : i32
    return %c0_i32, %c0_i32_0 : i32, i32
  }
  func.func @transform_7(%arg0: i32) -> (i32, i32) {
    %c0_i32 = arith.constant 0 : i32
    %c0_i32_0 = arith.constant 0 : i32
    return %arg0, %c0_i32 : i32, i32
  }
}

</mosaic_0001>

<bundles_post_ra>
// kernel: tpu_custom_call.1
= control target key start
LH: loop header
LB: loop body
LE: loop exit
PB: predicated region body
PF: predicated region fallthrough
CT: control target
= control target key end

     0   :  { %12 = vsyncpa [#allocation3], 0  ;;  %s337_s0 = inlined_call_operand.hbm [shape: bf16[8,32], index: 0, kind: input, shape index: {}]   ;;  %s338_s1 = inlined_call_operand.vmem [shape: bf16[32,32], index: 1, kind: input, shape index: {}]   ;;  %s339_s2 = inlined_call_operand.vmem [shape: f32[1,32], index: 2, kind: input, shape index: {}]   ;;  %s340_s3 = inlined_call_operand.vmem [shape: bf16[32,16], index: 3, kind: input, shape index: {}]   ;;  %s341_s4 = inlined_call_operand.vmem [shape: f32[1,16], index: 4, kind: input, shape index: {}]   ;;  %s342_s5 = inlined_call_operand.vmem [shape: bf16[16,128], index: 5, kind: input, shape index: {}]   ;;  %s343_s6 = inlined_call_operand.vmem [shape: f32[1,128], index: 6, kind: input, shape index: {}]   ;;  %s344_s7 = inlined_call_operand.hbm [shape: bf16[8,128], index: 7, kind: output, shape index: {}]  }
   0x1   :  { %13 = vsyncpa [#allocation4], 0  ;;  %s19_s26 = sshll.u32 %s337_s0, 4  ;;  %s262_s27 = smov [#allocation2]   ;;  %s20_s26 = int_to_ptr.hbm [resolvable:$true] %s19_s26 }
   0x2   :  { %s21_s28 = sshll.u32 %s262_s27, 4  ;;  %s22_s28 = int_to_ptr.vmem [resolvable:$true] %s21_s28 }
   0x3   :  { %24 = dma.hbm_to_vmem [thread:$0]  %s20_s26, 64, %s22_s28, [#allocation3]  }
   0x4   :  { %258 = dma.done.wait [#allocation3], 64  }
   0x5   :  { %259 = vsyncadd [#allocation3], 4294967232  ;;  %v200_v0 = vld [vmem:[%s338_s1 + $0x8] sm:$0xff]  ;;  %v199_v1 = vld [vmem:[%s338_s1] sm:$0xff]  ;;  %vm64_vm0 = vcmask 261120   ;;  %s263_s1 = smov 112  }
   0x6   :  { %74 = vmatpush.bf16.msra.mxu0 %v200_v0  ;;  %v42_v2 = vld [vmem:[#allocation2] sm:$0xf]  ;;  %v202_v3 = vld [vmem:[%s340_s3 + $0x8] sm:$0xff]  ;;  %vm140_vm1 = vcmask 130048  }
   0x7   :  { %113 = vmatpush.bf16.msra.mxu1 %v202_v3  ;;  %v201_v4 = vld [vmem:[%s340_s3] sm:$0xff]  ;;  %v43_v7 = vunpack.c.l.bf16 %v42_v2 }
   0x8   :  { %v207_v5 = vld [vmem:[%s339_s2] ss:$0 sm:$0xff] }
   0x9   :  { %v203_v13 = vld [vmem:[%s342_s5] sm:$0xff]  ;;  %s264_s5 = smov [#allocation5]  }
   0xa   :  { %75 = vmatpush.bf16.msra.mxu0 %v199_v1  ;;  %151 = vmatpush.bf16.msra.mxu2 %v203_v13  ;;  %v208_v14 = vld [vmem:[%s341_s4] ss:$0 sm:$0xff]  ;;  %s164_s19 = sshll.u32 %s264_s5, 4  ;;  %s166_s4 = sshll.u32 %s344_s7, 4  ;;  %s165_s19 = int_to_ptr.vmem [resolvable:$true] %s164_s19  ;;  %s167_s4 = int_to_ptr.hbm [resolvable:$true] %s166_s4 }
   0xb   :  { %114 = vmatpush.bf16.msra.mxu1 %v201_v4  ;;  %v209_v23 = vld [vmem:[%s343_s6] ss:$0 sm:$0xff] }
   0xd   :  { %184 = vmatmul.msk.bf16.vlgmr.msra.gmra.mxu0 %vm64_vm0, %v42_v2 }
  0x8a   :  { %v77_v6 = vpop.f32.mrf.mxu0 }
  0x8b   :  { %v78_v8 = vadd.f32 %v207_v5, %v77_v6 }
  0x8d   :  { %v81_v9 = vmax.f32 %v78_v8, 0.0 }
  0x8f   :  { %v82_v10 = vadd.f32 %v81_v9, %v43_v7 }
  0x91   :  { %122 = vrot.lane.b32.xlu0 %v82_v10, %s263_s1  ;;  %v83_v11 = vpack.c.bf16 %v82_v10, %v82_v10 }
  0x92   :  { %v79_v12 = vpop.f32.mrf.mxu0 }
  0x93   :  { %193 = vmatmul.msk.bf16.vlgmr.msra.gmra.mxu1 %vm64_vm0, %v83_v11 }
 0x103   :  { %v123_v15 = vpop.permute.xlu0 %122 }
 0x104   :  { %v125_v18 = vadd.f32 %v123_v15, %v82_v10 }
 0x110   :  { %v116_v16 = vpop.f32.mrf.mxu1 }
 0x111   :  { %v117_v17 = vadd.f32 %v208_v14, %v116_v16 }
 0x113   :  { %v120_v19 = vmax.f32 %v117_v17, 0.0 }
 0x115   :  { %v126_v20 = vadd.f32 %v125_v18, %v120_v19 }
 0x117   :  { %v127_v21 = vpack.c.bf16 %v126_v20, %v126_v20 }
 0x118   :  { %v118_v22 = vpop.f32.mrf.mxu1 }
 0x119   :  { %198 = vmatmul.msk.bf16.vlgmr.msra.gmra.mxu2 %vm140_vm1, %v127_v21 }
 0x19c   :  { %v153_v24 = vpop.f32.mrf.mxu2 }
 0x19d   :  { %v154_v25 = vadd.f32 %v209_v23, %v153_v24 }
 0x19f   :  { %v157_v26 = vpack.c.bf16 %v154_v25, %v154_v25 }
 0x1a1   :  { %158 = vst [vmem:[#allocation5] sm:$0xf] %v157_v26 }
 0x1a2   :  { %169 = dma.vmem_to_hbm [thread:$0]  %s165_s19, 64, %s167_s4, [#allocation4]  }
 0x1a4   :  { %v155_v27 = vpop.f32.mrf.mxu2 }
 0x1a5   :  { %260 = dma.done.wait [#allocation4], 64  }
 0x1a6   :  { %261 = vsyncadd [#allocation4], 4294967232 }
 0x1a7   :  { %174 = vsyncpa [#allocation3], 1 }
 0x1a8   :  { %175 = vsyncpa [#allocation4], 1 }

// kernel: tpu_custom_call.1
= control target key start
LH: loop header
LB: loop body
LE: loop exit
PB: predicated region body
PF: predicated region fallthrough
CT: control target
= control target key end

     0   :  { %12 = vsyncpa [#allocation3], 0  ;;  %s337_s0 = inlined_call_operand.hbm [shape: bf16[8,32], index: 0, kind: input, shape index: {}]   ;;  %s338_s1 = inlined_call_operand.vmem [shape: bf16[32,32], index: 1, kind: input, shape index: {}]   ;;  %s339_s2 = inlined_call_operand.vmem [shape: f32[1,32], index: 2, kind: input, shape index: {}]   ;;  %s340_s3 = inlined_call_operand.vmem [shape: bf16[32,16], index: 3, kind: input, shape index: {}]   ;;  %s341_s4 = inlined_call_operand.vmem [shape: f32[1,16], index: 4, kind: input, shape index: {}]   ;;  %s342_s5 = inlined_call_operand.vmem [shape: bf16[16,128], index: 5, kind: input, shape index: {}]   ;;  %s343_s6 = inlined_call_operand.vmem [shape: f32[1,128], index: 6, kind: input, shape index: {}]   ;;  %s344_s7 = inlined_call_operand.hbm [shape: bf16[8,128], index: 7, kind: output, shape index: {}]  }
   0x1   :  { %13 = vsyncpa [#allocation4], 0  ;;  %s19_s26 = sshll.u32 %s337_s0, 4  ;;  %s262_s27 = smov [#allocation2]   ;;  %s20_s26 = int_to_ptr.hbm [resolvable:$true] %s19_s26 }
   0x2   :  { %s21_s28 = sshll.u32 %s262_s27, 4  ;;  %s22_s28 = int_to_ptr.vmem [resolvable:$true] %s21_s28 }
   0x3   :  { %24 = dma.hbm_to_vmem [thread:$0]  %s20_s26, 64, %s22_s28, [#allocation3]  }
   0x4   :  { %258 = dma.done.wait [#allocation3], 64  }
   0x5   :  { %259 = vsyncadd [#allocation3], 4294967232  ;;  %v200_v0 = vld [vmem:[%s338_s1 + $0x8] sm:$0xff]  ;;  %v199_v1 = vld [vmem:[%s338_s1] sm:$0xff]  ;;  %vm64_vm0 = vcmask 261120   ;;  %s263_s1 = smov 112  }
   0x6   :  { %74 = vmatpush.bf16.msra.mxu0 %v200_v0  ;;  %v42_v2 = vld [vmem:[#allocation2] sm:$0xf]  ;;  %v202_v3 = vld [vmem:[%s340_s3 + $0x8] sm:$0xff]  ;;  %vm140_vm1 = vcmask 130048  }
   0x7   :  { %113 = vmatpush.bf16.msra.mxu1 %v202_v3  ;;  %v201_v4 = vld [vmem:[%s340_s3] sm:$0xff]  ;;  %v43_v7 = vunpack.c.l.bf16 %v42_v2 }
   0x8   :  { %v207_v5 = vld [vmem:[%s339_s2] ss:$0 sm:$0xff] }
   0x9   :  { %v203_v13 = vld [vmem:[%s342_s5] sm:$0xff]  ;;  %s264_s5 = smov [#allocation5]  }
   0xa   :  { %75 = vmatpush.bf16.msra.mxu0 %v199_v1  ;;  %151 = vmatpush.bf16.msra.mxu2 %v203_v13  ;;  %v208_v14 = vld [vmem:[%s341_s4] ss:$0 sm:$0xff]  ;;  %s164_s19 = sshll.u32 %s264_s5, 4  ;;  %s166_s4 = sshll.u32 %s344_s7, 4  ;;  %s165_s19 = int_to_ptr.vmem [resolvable:$true] %s164_s19  ;;  %s167_s4 = int_to_ptr.hbm [resolvable:$true] %s166_s4 }
   0xb   :  { %114 = vmatpush.bf16.msra.mxu1 %v201_v4  ;;  %v209_v23 = vld [vmem:[%s343_s6] ss:$0 sm:$0xff] }
   0xd   :  { %184 = vmatmul.msk.bf16.vlgmr.msra.gmra.mxu0 %vm64_vm0, %v42_v2 }
  0x8a   :  { %v77_v6 = vpop.f32.mrf.mxu0 }
  0x8b   :  { %v78_v8 = vadd.f32 %v207_v5, %v77_v6 }
  0x8d   :  { %v81_v9 = vmax.f32 %v78_v8, 0.0 }
  0x8f   :  { %v82_v10 = vadd.f32 %v81_v9, %v43_v7 }
  0x91   :  { %122 = vrot.lane.b32.xlu0 %v82_v10, %s263_s1  ;;  %v83_v11 = vpack.c.bf16 %v82_v10, %v82_v10 }
  0x92   :  { %v79_v12 = vpop.f32.mrf.mxu0 }
  0x93   :  { %193 = vmatmul.msk.bf16.vlgmr.msra.gmra.mxu1 %vm64_vm0, %v83_v11 }
 0x103   :  { %v123_v15 = vpop.permute.xlu0 %122 }
 0x104   :  { %v125_v18 = vadd.f32 %v123_v15, %v82_v10 }
 0x110   :  { %v116_v16 = vpop.f32.mrf.mxu1 }
 0x111   :  { %v117_v17 = vadd.f32 %v208_v14, %v116_v16 }
 0x113   :  { %v120_v19 = vmax.f32 %v117_v17, 0.0 }
 0x115   :  { %v126_v20 = vadd.f32 %v125_v18, %v120_v19 }
 0x117   :  { %v127_v21 = vpack.c.bf16 %v126_v20, %v126_v20 }
 0x118   :  { %v118_v22 = vpop.f32.mrf.mxu1 }
 0x119   :  { %198 = vmatmul.msk.bf16.vlgmr.msra.gmra.mxu2 %vm140_vm1, %v127_v21 }
 0x19c   :  { %v153_v24 = vpop.f32.mrf.mxu2 }
 0x19d   :  { %v154_v25 = vadd.f32 %v209_v23, %v153_v24 }
 0x19f   :  { %v157_v26 = vpack.c.bf16 %v154_v25, %v154_v25 }
 0x1a1   :  { %158 = vst [vmem:[#allocation5] sm:$0xf] %v157_v26 }
 0x1a2   :  { %169 = dma.vmem_to_hbm [thread:$0]  %s165_s19, 64, %s167_s4, [#allocation4]  }
 0x1a4   :  { %v155_v27 = vpop.f32.mrf.mxu2 }
 0x1a5   :  { %260 = dma.done.wait [#allocation4], 64  }
 0x1a6   :  { %261 = vsyncadd [#allocation4], 4294967232 }
 0x1a7   :  { %174 = vsyncpa [#allocation3], 1 }
 0x1a8   :  { %175 = vsyncpa [#allocation4], 1 }

</bundles_post_ra>
